<compile_context>
chip_gen: v7x
topology: tpu7x:2x2x1
jax: 0.10.0
libtpu: 0.0.40
codegen_flags: <defaults>
</compile_context>

<pallas_src>
import functools

import numpy as np
import jax
import jax.numpy as jnp
from jax.experimental import pallas as pl
from jax.experimental.pallas import tpu as pltpu


# ---------------------------------------------------------------------------
# Pallas kernel
# ---------------------------------------------------------------------------
def _bilinear_kernel(x_ref, m_ref, tile_ref, agg_ref, o_ref):
    """x:(tb,repin)  m:(repin,O*R)  tile:(repin,O*R) one-hot  agg:(O*R,O) one-hot."""
    x = x_ref[...]
    # Per-sample flattened equivariant weight matrix: w_flat[b, o*repin + r].
    w_flat = jnp.dot(x, m_ref[...], preferred_element_type=jnp.float32)
    # x broadcast across the repout groups along the lane axis (exact one-hot
    # matmul -> stays 2-D / lane-native; avoids in-kernel reshape or jnp.tile).
    x_rep = jnp.dot(x, tile_ref[...], preferred_element_type=jnp.float32)
    # Grouped reduction: out[b, o] = sum_r w_flat[b, o*R + r] * x[b, r].
    out = jnp.dot(w_flat * x_rep, agg_ref[...], preferred_element_type=jnp.float32)
    o_ref[...] = (0.1 * out).astype(o_ref.dtype)


# ---------------------------------------------------------------------------
# Wrapper
# ---------------------------------------------------------------------------
def _round_up(v, m):
    return ((v + m - 1) // m) * m


@functools.lru_cache(maxsize=None)
def _selection_matrices(repin, repout, dtype_name):
    """Static one-hot broadcast / group-sum matrices (built once, cached)."""
    OR = repout * repin
    tilem = np.zeros((repin, OR), np.float32)          # TileM[r, o*R + r] = 1
    r = np.arange(repin)
    for o in range(repout):
        tilem[r, o * repin + r] = 1.0
    agg = np.zeros((OR, repout), np.float32)           # Agg[o*R + r, o] = 1
    agg[np.arange(OR), np.arange(OR) // repin] = 1.0
    return jnp.asarray(tilem, dtype=dtype_name), jnp.asarray(agg, dtype=dtype_name)


def equivariant_bilinear(x, M_proj, repout, *, tb=None):
    """out[..., o] = 0.1 * sum_r (x @ M_proj)[..., o*repin + r] * x[..., r]."""
    repin = x.shape[-1]
    OR = repout * repin
    assert M_proj.shape == (repin, OR)

    bshape = x.shape[:-1]
    x_flat = x.reshape(-1, repin)                      # arbitrary leading dims
    B = x_flat.shape[0]

    if tb is None:
        tb = min(1024, _round_up(max(B, 1), 8))        # large 8-aligned batch tile
    tb = _round_up(tb, 8)
    B_pad = _round_up(max(B, 1), tb)                   # ceil-div grid, no dropped rows
    if B_pad != B:
        x_flat = jnp.pad(x_flat, ((0, B_pad - B), (0, 0)))

    tilem, agg = _selection_matrices(repin, repout, str(np.dtype(x.dtype)))

    itemsize = np.dtype(x.dtype).itemsize
    cost = pl.CostEstimate(
        flops=int(B_pad * (4 * repin * OR + OR + 2 * OR * repout + repout)),
        transcendentals=0,
        bytes_accessed=int(itemsize * (B_pad * repin + B_pad * repout
                                       + 2 * repin * OR + OR * repout)),
    )

    # TODO(synk): for very large repout*repin (M no longer VMEM-resident), add a
    # second grid axis tiling the repout groups; not needed at these sizes.
    out = pl.pallas_call(
        _bilinear_kernel,
        out_shape=jax.ShapeDtypeStruct((B_pad, repout), x.dtype),
        grid_spec=pl.GridSpec(
            grid=(B_pad // tb,),
            in_specs=[
                pl.BlockSpec((tb, repin), lambda i: (i, 0)),
                pl.BlockSpec((repin, OR), lambda i: (0, 0)),   # resident across tiles
                pl.BlockSpec((repin, OR), lambda i: (0, 0)),
                pl.BlockSpec((OR, repout), lambda i: (0, 0)),
            ],
            out_specs=pl.BlockSpec((tb, repout), lambda i: (i, 0)),
        ),
        compiler_params=pltpu.CompilerParams(dimension_semantics=("parallel",)),
        cost_estimate=cost,
    )(x_flat, M_proj.astype(x.dtype), tilem, agg)

    return out[:B].reshape(*bshape, repout)


# ---------------------------------------------------------------------------
# Folding the torchemlp bilinear structure into one projection matrix
# ---------------------------------------------------------------------------
def build_projection_matrix(Ws, params, repin, repout):
    """M (repin, repout*repin) with W_hat_b.flatten() = x_b @ M (row-major (o, r))."""
    ns, rep_sizes, W_mults, bids, slcs, W_invperm = params
    A = jnp.zeros((repin * repin, repin), jnp.float32)     # W_proj[b] = A @ x_b
    for n, rs, wm, bid, W, sl in zip(ns, rep_sizes, W_mults, bids, Ws, slcs):
        # G[j, k, d] = 1  iff  d == bid[j*rs + k]   (static one-hot gather tensor)
        G = np.zeros((n, rs, repin), np.float32)
        G[np.arange(n)[:, None], np.arange(rs)[None, :],
          np.asarray(bid).reshape(n, rs)] = 1.0
        block = jnp.tensordot(W.reshape(wm, n), jnp.asarray(G), axes=[[1], [0]])
        A = A.at[sl].set(block.reshape(wm * rs, repin))
    return A[np.asarray(W_invperm)].T                      # (repin, repout*repin)


# ---------------------------------------------------------------------------
# Synthetic (deterministic) bilinear_params-style structure + pure-JAX reference
# ---------------------------------------------------------------------------
REPIN = 24    # repin.size  (x channel dim)
REPOUT = 16   # repout.size


def make_synthetic_bilinear_params():
    # TODO(synk): bilinear_params(repin, repout) needs the group-representation
    # machinery (SumRep); reproduced here with a deterministic synthetic structure.
    ns        = [8, 4]          # multiplicities of each rep in the input
    rep_sizes = [1, 4]          # sizes of those reps  (8*1 + 4*4 = 24 = REPIN)
    W_mults   = [40, 30]        # multiplicities inside the W rep
    bids = [np.arange(8, dtype=np.int32),            # copy-major channel indices
            np.arange(8, 24, dtype=np.int32)]
    slcs, off = [], 0
    for rs, wm in zip(rep_sizes, W_mults):
        slcs.append(slice(off, off + wm * rs))
        off += wm * rs
    rng = np.random.default_rng(0)
    W_invperm = rng.permutation(REPIN * REPIN)[: REPOUT * REPIN].astype(np.int32)
    return ns, rep_sizes, W_mults, bids, slcs, W_invperm


def reference_forward(x, Ws, params, repout):
    """Literal pure-JAX translation of EquivariantBiLinear.forward."""
    ns, rep_sizes, W_mults, bids, slcs, W_invperm = params
    bshape = x.shape[:-1]
    x_flat = x.reshape(-1, x.shape[-1])
    B, x_dim = x_flat.shape
    W_proj = jnp.zeros((B, x_dim * x_dim), x.dtype)
    for n, rs, wm, bid, W, sl in zip(ns, rep_sizes, W_mults, bids, Ws, slcs):
        x_rep = x_flat[:, jnp.asarray(bid)].T.reshape(n, rs * B)
        x_proj = W.reshape(wm, n) @ x_rep
        W_proj = W_proj.at[:, sl].set(x_proj.reshape(wm * rs, B).T)
    W_perm = W_proj[:, jnp.asarray(W_invperm)].reshape(*bshape, repout, x_dim)
    return 0.1 * jnp.squeeze(W_perm @ x[..., None], axis=-1)


# ---------------------------------------------------------------------------
# Demo / smoke test
# ---------------------------------------------------------------------------
if __name__ == "__main__":
    params = make_synthetic_bilinear_params()
    ns, rep_sizes, W_mults, bids, slcs, W_invperm = params

    key = jax.random.PRNGKey(0)
    kx, *kws = jax.random.split(key, 1 + len(ns))

    # Keep test operands exactly representable in bf16 so MXU-pass rounding in
    # the kernel vs. XLA's f32 dots in the reference cannot blow the comparison.
    def q(a):
        return a.astype(jnp.bfloat16).astype(jnp.float32)

    Ws = [q(jax.random.normal(k, (n * wm,), jnp.float32))
          for k, n, wm in zip(kws, ns, W_mults)]
    x = q(jax.random.normal(kx, (3, 6, REPIN), jnp.float32))   # arbitrary leading dims

    # Built once per set of Ws (not per forward call).
    M_proj = build_projection_matrix(Ws, params, REPIN, REPOUT)

    # tb=8 -> 18 rows padded to 24, grid=(3,): exercises tiling + remainder padding.
    out = equivariant_bilinear(x, M_proj, REPOUT, tb=8)
    out = jax.block_until_ready(out)
    assert out.shape == (3, 6, REPOUT)

    ref = reference_forward(x, Ws, params, REPOUT)
    # Tolerance accommodates MXU bf16-pass accumulation differences vs. XLA f32.
    np.testing.assert_allclose(np.asarray(out), np.asarray(ref), rtol=2e-2, atol=2e-2)

    print("KERNEL_OK")
</pallas_src>

<mosaic_0001>
module attributes {stable_mosaic.version = 11 : i64} {
  func.func @_bilinear_kernel(%arg0: i32, %arg1: memref<8x24xf32, #tpu.memory_space<vmem>>, %arg2: memref<24x384xf32, #tpu.memory_space<vmem>>, %arg3: memref<24x384xf32, #tpu.memory_space<vmem>>, %arg4: memref<384x16xf32, #tpu.memory_space<vmem>>, %arg5: memref<8x16xf32, #tpu.memory_space<vmem>>) attributes {dimension_semantics = [#tpu.dimension_semantics<parallel>], iteration_bounds = array<i64: 3>, scalar_prefetch = 0 : i64, scratch_operands = 0 : i64, tpu.core_type = #tpu.core_type<tc>, window_params = [{transform_indices = @transform_0, window_bounds = array<i64: 8, 24>}, {pipeline_mode = #tpu.pipeline_mode<synchronous>, transform_indices = @transform_1, window_bounds = array<i64: 24, 384>}, {pipeline_mode = #tpu.pipeline_mode<synchronous>, transform_indices = @transform_2, window_bounds = array<i64: 24, 384>}, {pipeline_mode = #tpu.pipeline_mode<synchronous>, transform_indices = @transform_3, window_bounds = array<i64: 384, 16>}, {transform_indices = @transform_4, window_bounds = array<i64: 8, 16>}]} {
    %c0 = arith.constant 0 : index
    %c0_0 = arith.constant 0 : index
    %0 = vector.load %arg1[%c0, %c0_0] : memref<8x24xf32, #tpu.memory_space<vmem>>, vector<8x24xf32>
    %c0_1 = arith.constant 0 : index
    %c0_2 = arith.constant 0 : index
    %1 = vector.load %arg2[%c0_1, %c0_2] : memref<24x384xf32, #tpu.memory_space<vmem>>, vector<24x384xf32>
    %cst = arith.constant dense<0.000000e+00> : vector<8x384xf32>
    %2 = tpu.matmul %0, %1, %cst {dimension_numbers = #tpu.dot_dimension_numbers<[1], [0], [0], [1], [0, 0, 1, 1], [], []>} : vector<8x24xf32>, vector<24x384xf32>, vector<8x384xf32> -> vector<8x384xf32>
    %c0_3 = arith.constant 0 : index
    %c0_4 = arith.constant 0 : index
    %3 = vector.load %arg3[%c0_3, %c0_4] : memref<24x384xf32, #tpu.memory_space<vmem>>, vector<24x384xf32>
    %cst_5 = arith.constant dense<0.000000e+00> : vector<8x384xf32>
    %4 = tpu.matmul %0, %3, %cst_5 {dimension_numbers = #tpu.dot_dimension_numbers<[1], [0], [0], [1], [0, 0, 1, 1], [], []>} : vector<8x24xf32>, vector<24x384xf32>, vector<8x384xf32> -> vector<8x384xf32>
    %5 = arith.mulf %2, %4 : vector<8x384xf32>
    %c0_6 = arith.constant 0 : index
    %c0_7 = arith.constant 0 : index
    %6 = vector.load %arg4[%c0_6, %c0_7] : memref<384x16xf32, #tpu.memory_space<vmem>>, vector<384x16xf32>
    %cst_8 = arith.constant dense<0.000000e+00> : vector<8x16xf32>
    %7 = tpu.matmul %5, %6, %cst_8 {dimension_numbers = #tpu.dot_dimension_numbers<[1], [0], [0], [1], [0, 0, 1, 1], [], []>} : vector<8x384xf32>, vector<384x16xf32>, vector<8x16xf32> -> vector<8x16xf32>
    %cst_9 = arith.constant 1.000000e-01 : f32
    %8 = vector.broadcast %cst_9 : f32 to vector<8x16xf32>
    %9 = arith.mulf %8, %7 : vector<8x16xf32>
    %c0_10 = arith.constant 0 : index
    %c0_11 = arith.constant 0 : index
    %10 = vector.load %arg5[%c0_10, %c0_11] : memref<8x16xf32, #tpu.memory_space<vmem>>, vector<8x16xf32>
    tpu.vector_store %arg5[%c0_10, %c0_11], %9 {strides = array<i32>} : memref<8x16xf32, #tpu.memory_space<vmem>>, vector<8x16xf32>,
    return
  }
  func.func @transform_0(%arg0: i32) -> (i32, i32) {
    %c0_i32 = arith.constant 0 : i32
    %c0_i32_0 = arith.constant 0 : i32
    return %arg0, %c0_i32 : i32, i32
  }
  func.func @transform_1(%arg0: i32) -> (i32, i32) {
    %c0_i32 = arith.constant 0 : i32
    %c0_i32_0 = arith.constant 0 : i32
    %c0_i32_1 = arith.constant 0 : i32
    return %c0_i32, %c0_i32_0 : i32, i32
  }
  func.func @transform_2(%arg0: i32) -> (i32, i32) {
    %c0_i32 = arith.constant 0 : i32
    %c0_i32_0 = arith.constant 0 : i32
    %c0_i32_1 = arith.constant 0 : i32
    return %c0_i32, %c0_i32_0 : i32, i32
  }
  func.func @transform_3(%arg0: i32) -> (i32, i32) {
    %c0_i32 = arith.constant 0 : i32
    %c0_i32_0 = arith.constant 0 : i32
    %c0_i32_1 = arith.constant 0 : i32
    return %c0_i32, %c0_i32_0 : i32, i32
  }
  func.func @transform_4(%arg0: i32) -> (i32, i32) {
    %c0_i32 = arith.constant 0 : i32
    %c0_i32_0 = arith.constant 0 : i32
    return %arg0, %c0_i32 : i32, i32
  }
}

</mosaic_0001>

<bundles_post_ra>
// kernel: tpu_custom_call.1
= control target key start
LH: loop header
LB: loop body
LE: loop exit
PB: predicated region body
PF: predicated region fallthrough
CT: control target
= control target key end

     0   :  { %s988_s15 = smov 0   ;;  %s1234_s0 = inlined_call_operand.vmem [shape: f32[24,24], index: 0, kind: input, shape index: {}]   ;;  %s1235_s1 = inlined_call_operand.vmem [shape: f32[24,384], index: 1, kind: input, shape index: {}]   ;;  %s1236_s2 = inlined_call_operand.vmem [shape: f32[24,384], index: 2, kind: input, shape index: {}]   ;;  %s1237_s3 = inlined_call_operand.vmem [shape: f32[384,16], index: 3, kind: input, shape index: {}]   ;;  %s1238_s4 = inlined_call_operand.vmem [shape: f32[24,16], index: 4, kind: output, shape index: {}]  }
   0x1 LB: > { %s745_s16 = sadd.s32 4294967295, %s958_s15   ;;  %p749_p0 = scmp.ge.s32.totalorder %s958_s15, 1  ;;  %s958_s15 = sphi %s988_s15, %s14_s15  }
   0x2   : > { %p161_p1 = scmp.lt.s32.totalorder %s958_s15, 4 }
   0x4   : > { %p162_p2 = pnand %p749_p0, %p161_p1 }
   0x5   : > { %v195_v0 = vld [vmem:[%s1235_s1 + $0x8] sm:$0xff] (!%p162_p2)  ;;  %v198_v1 = vld [vmem:[%s1235_s1 + $0x20] sm:$0xff] (!%p162_p2)  ;;  %v196_v2 = vld [vmem:[%s1235_s1 + $0x10] sm:$0xff] (!%p162_p2)  ;;  %v960_v3 = vmov (!%p162_p2), 0.0|0.0   ;;  %v961_v8 = vmov (!%p162_p2), 0.0   ;;  %p185_p3 = scmp.lt.s32.totalorder (!%p162_p2), %s745_s16, 2 }
   0x6   : > { %165 = sbr.rel (%p162_p2) target bundleno = 459 (0x1cb), region = 36  ;;  %875 = vmatprep.subr.bf16.mxu1 (!%p162_p2), %v960_v3  ;;  %v871_v4 = vpack.c.bf16 (!%p162_p2), %v198_v1, %v195_v0  ;;  %v199_v5 = vld [vmem:[%s1235_s1 + $0x28] sm:$0xff] (!%p162_p2)  ;;  %v194_v6 = vld [vmem:[%s1235_s1] sm:$0xff] (!%p162_p2)  ;;  %v197_v7 = vld [vmem:[%s1235_s1 + $0x18] sm:$0xff] (!%p162_p2)  ;;  %271 = vmatprep.mubr.f32.mxu0 (!%p162_p2), %v961_v8  ;;  %vm962_vm0 = vmmov (!%p162_p2), 0   ;;  %vm203_vm1 = vcmask (!%p162_p2), 195584  }
   0x7   : > { %v876_v9 = vpack.c.bf16 (!%p162_p2), %v199_v5, %v196_v2  ;;  %v873_v10 = vpack.c.bf16 (!%p162_p2), %v197_v7, %v194_v6  ;;  %v201_v11 = vld [vmem:[%s1235_s1 + $0x38] sm:$0xff] (!%p162_p2)  ;;  %824 = vmatprep.mubr.msk.f32.mxu1 (!%p162_p2), %vm962_vm0, %v961_v8  ;;  %v349_v12 = vld [vmem:[%s1236_s2 + $0x8] sm:$0xff] (!%p162_p2)  ;;  %v352_v13 = vld [vmem:[%s1236_s2 + $0x20] sm:$0xff] (!%p162_p2)  ;;  %vm690_vm2 = vcmask (!%p162_p2), 130048  }
   0x8   : > { %872 = vmatprep.subr.bf16.mxu0 (!%p162_p2), %v871_v4  ;;  %v350_v14 = vld [vmem:[%s1236_s2 + $0x10] sm:$0xff] (!%p162_p2)  ;;  %v353_v15 = vld [vmem:[%s1236_s2 + $0x28] sm:$0xff] (!%p162_p2)  ;;  %v348_v16 = vld [vmem:[%s1236_s2] sm:$0xff] (!%p162_p2)  ;;  %v878_v20 = vpack.c.bf16 (!%p162_p2), %v352_v13, %v349_v12 }
   0x9   : > { %877 = vmatpush3.bf16.msra.mxu1 (!%p162_p2), %v876_v9  ;;  %874 = vmatpush1.bf16.msra.mxu0 (!%p162_p2), %v873_v10  ;;  %v351_v17 = vld [vmem:[%s1236_s2 + $0x18] sm:$0xff] (!%p162_p2)  ;;  %v202_v18 = vld [vmem:[%s1235_s1 + $0x40] sm:$0xff] (!%p162_p2)  ;;  %v200_v19 = vld [vmem:[%s1235_s1 + $0x30] sm:$0xff] (!%p162_p2)  ;;  %v883_v22 = vpack.c.bf16 (!%p162_p2), %v353_v15, %v350_v14 }
   0xa   : > { %822 = vmatprep.subr.mxu1 (!%p162_p2), %v961_v8  ;;  %211 = vmatprep.subr.mxu0 (!%p162_p2), %v201_v11  ;;  %v880_v23 = vpack.c.bf16 (!%p162_p2), %v351_v17, %v348_v16  ;;  %v355_v24 = vld [vmem:[%s1236_s2 + $0x38] sm:$0xff] (!%p162_p2)  ;;  %v356_v25 = vld [vmem:[%s1236_s2 + $0x40] sm:$0xff] (!%p162_p2)  ;;  %v518_v28 = vld [vmem:[%s1237_s3 + $0x88] sm:$0xff] (!%p162_p2) }
   0xb   : > { %v533_v26 = vld [vmem:[%s1237_s3 + $0x100] sm:$0xff] (!%p162_p2)  ;;  %v534_v29 = vld [vmem:[%s1237_s3 + $0x108] sm:$0xff] (!%p162_p2)  ;;  %v354_v32 = vld [vmem:[%s1236_s2 + $0x30] sm:$0xff] (!%p162_p2) }
   0xc   : > { %v517_v27 = vld [vmem:[%s1237_s3 + $0x80] sm:$0xff] (!%p162_p2)  ;;  %v502_v31 = vld [vmem:[%s1237_s3 + $0x8] sm:$0xff] (!%p162_p2)  ;;  %v519_v33 = vld [vmem:[%s1237_s3 + $0x90] sm:$0xff] (!%p162_p2)  ;;  %v918_v36 = vpack.c.bf16 (!%p162_p2), %v534_v29, %v533_v26 }
   0xd   : > { %s1240_s16 = smov (!%p185_p3, %s745_s16), 2  ;;  %823 = vmatpush3.msra.mxu1 %v202_v18  ;;  %212 = vmatpush1.msra.mxu0 %v200_v19  ;;  %v501_v30 = vld [vmem:[%s1237_s3] sm:$0xff]  ;;  %v520_v34 = vld [vmem:[%s1237_s3 + $0x98] sm:$0xff]  ;;  %v885_v35 = vpack.c.bf16 %v518_v28, %v517_v27  ;;  %v535_v38 = vld [vmem:[%s1237_s3 + $0x110] sm:$0xff] }
   0xe   : > { %s750_s23 = sshll.u32 %s1240_s16, 3  ;;  %882 = vmatprep.subr.bf16.mxu1 %v960_v3  ;;  %879 = vmatprep.subr.bf16.mxu0 %v878_v20  ;;  %v887_v37 = vpack.c.bf16 %v502_v31, %v501_v30  ;;  %v536_v39 = vld [vmem:[%s1237_s3 + $0x118] sm:$0xff]  ;;  %v889_v40 = vpack.c.bf16 %v520_v34, %v519_v33  ;;  %v503_v41 = vld [vmem:[%s1237_s3 + $0x10] sm:$0xff]  ;;  %v521_v43 = vld [vmem:[%s1237_s3 + $0xa0] sm:$0xff] }
   0xf   : > { %s188_s26 = scalar_lea.vmem %s1234_s0, %s750_s23  ;;  %v504_v42 = vld [vmem:[%s1237_s3 + $0x18] sm:$0xff]  ;;  %v522_v44 = vld [vmem:[%s1237_s3 + $0xa8] sm:$0xff]  ;;  %v921_v45 = vpack.c.bf16 %v536_v39, %v535_v38  ;;  %v537_v47 = vld [vmem:[%s1237_s3 + $0x120] sm:$0xff]  ;;  %s192_s13 = scalar_lea.vmem %s1238_s4, %s750_s23 }
  0x10   : > { %v193_v21 = vld [vmem:[%s188_s26] sm:$0xff]  ;;  %v891_v46 = vpack.c.bf16 %v504_v42, %v503_v41  ;;  %v538_v48 = vld [vmem:[%s1237_s3 + $0x128] sm:$0xff]  ;;  %v893_v49 = vpack.c.bf16 %v522_v44, %v521_v43  ;;  %v523_v52 = vld [vmem:[%s1237_s3 + $0xb0] sm:$0xff] }
  0x11   : > { %752 = vmatmul.mubr.msk.f32.vlgmr.msra.gmra.mrb[0].mxu0 %vm203_vm1, %v193_v21  ;;  %825 = vmatmul.mubr.msk.f32.vlgmr.msra.gmra.mrb[0].mxu1 %vm203_vm1, %v193_v21  ;;  %v505_v50 = vld [vmem:[%s1237_s3 + $0x20] sm:$0xff]  ;;  %v506_v51 = vld [vmem:[%s1237_s3 + $0x28] sm:$0xff]  ;;  %v524_v53 = vld [vmem:[%s1237_s3 + $0xb8] sm:$0xff]  ;;  %v924_v54 = vpack.c.bf16 %v538_v48, %v537_v47 }
  0x12   : > { %884 = vmatpush3.bf16.msra.mxu1 %v883_v22  ;;  %881 = vmatpush1.bf16.msra.mxu0 %v880_v23  ;;  %v895_v55 = vpack.c.bf16 %v506_v51, %v505_v50  ;;  %v539_v56 = vld [vmem:[%s1237_s3 + $0x130] sm:$0xff]  ;;  %v540_v57 = vld [vmem:[%s1237_s3 + $0x138] sm:$0xff]  ;;  %v897_v58 = vpack.c.bf16 %v524_v53, %v523_v52  ;;  %v525_v61 = vld [vmem:[%s1237_s3 + $0xc0] sm:$0xff] }
  0x13   : > { %831 = vmatprep.subr.mxu1 %v961_v8  ;;  %361 = vmatprep.subr.mxu0 %v355_v24  ;;  %v507_v59 = vld [vmem:[%s1237_s3 + $0x30] sm:$0xff]  ;;  %v508_v60 = vld [vmem:[%s1237_s3 + $0x38] sm:$0xff]  ;;  %v526_v62 = vld [vmem:[%s1237_s3 + $0xc8] sm:$0xff]  ;;  %v927_v63 = vpack.c.bf16 %v540_v57, %v539_v56 }
  0x14   : > { %833 = vmatprep.mubr.msk.f32.mxu1 %vm962_vm0, %v961_v8  ;;  %421 = vmatprep.mubr.f32.mxu0 %v961_v8  ;;  %v899_v0 = vpack.c.bf16 %v508_v60, %v507_v59  ;;  %v541_v1 = vld [vmem:[%s1237_s3 + $0x140] sm:$0xff]  ;;  %v542_v2 = vld [vmem:[%s1237_s3 + $0x148] sm:$0xff]  ;;  %v901_v4 = vpack.c.bf16 %v526_v62, %v525_v61  ;;  %v527_v7 = vld [vmem:[%s1237_s3 + $0xd0] sm:$0xff] }
  0x15   : > { %v509_v5 = vld [vmem:[%s1237_s3 + $0x40] sm:$0xff]  ;;  %v510_v6 = vld [vmem:[%s1237_s3 + $0x48] sm:$0xff]  ;;  %v930_v9 = vpack.c.bf16 %v542_v2, %v541_v1  ;;  %v543_v11 = vld [vmem:[%s1237_s3 + $0x150] sm:$0xff] }
  0x16   : > { %832 = vmatpush3.msra.mxu1 %v356_v25  ;;  %362 = vmatpush1.msra.mxu0 %v354_v32  ;;  %v903_v10 = vpack.c.bf16 %v510_v6, %v509_v5  ;;  %v544_v12 = vld [vmem:[%s1237_s3 + $0x158] sm:$0xff]  ;;  %v511_v15 = vld [vmem:[%s1237_s3 + $0x50] sm:$0xff]  ;;  %v545_v18 = vld [vmem:[%s1237_s3 + $0x160] sm:$0xff] }
  0x17   : > { %834 = vmatmul.mubr.msk.f32.vlgmr.msra.gmra.mrb[2].mxu1 %vm203_vm1, %v193_v21  ;;  %754 = vmatmul.mubr.msk.f32.vlgmr.msra.gmra.mrb[2].mxu0 %vm203_vm1, %v193_v21  ;;  %v933_v14 = vpack.c.bf16 %v544_v12, %v543_v11  ;;  %v512_v16 = vld [vmem:[%s1237_s3 + $0x58] sm:$0xff]  ;;  %v546_v19 = vld [vmem:[%s1237_s3 + $0x168] sm:$0xff]  ;;  %v529_v21 = vld [vmem:[%s1237_s3 + $0xe0] sm:$0xff] }
  0x18   : > { %917 = vmatprep.subr.bf16.mxu1 %v960_v3  ;;  %886 = vmatprep.subr.bf16.mxu0 %v885_v35  ;;  %v907_v17 = vpack.c.bf16 %v512_v16, %v511_v15  ;;  %v936_v20 = vpack.c.bf16 %v546_v19, %v545_v18  ;;  %v530_v22 = vld [vmem:[%s1237_s3 + $0xe8] sm:$0xff]  ;;  %v513_v24 = vld [vmem:[%s1237_s3 + $0x60] sm:$0xff]  ;;  %v547_v27 = vld [vmem:[%s1237_s3 + $0x170] sm:$0xff] }
  0x19   : > { %919 = vmatpush3.bf16.msra.mxu1 %v918_v36  ;;  %888 = vmatpush3.bf16.msra.mxu0 %v887_v37  ;;  %v909_v23 = vpack.c.bf16 %v530_v22, %v529_v21  ;;  %v514_v25 = vld [vmem:[%s1237_s3 + $0x68] sm:$0xff]  ;;  %v548_v28 = vld [vmem:[%s1237_s3 + $0x178] sm:$0xff]  ;;  %v531_v30 = vld [vmem:[%s1237_s3 + $0xf0] sm:$0xff] }
  0x1a   : > { %920 = vmatprep.subr.bf16.mxu1 %v960_v3  ;;  %890 = vmatprep.subr.bf16.mxu0 %v889_v40  ;;  %v911_v26 = vpack.c.bf16 %v514_v25, %v513_v24  ;;  %v939_v29 = vpack.c.bf16 %v548_v28, %v547_v27  ;;  %v532_v31 = vld [vmem:[%s1237_s3 + $0xf8] sm:$0xff]  ;;  %v515_v32 = vld [vmem:[%s1237_s3 + $0x70] sm:$0xff] }
  0x1b   : > { %868 = vmatprep.mubr.msk.f32.mxu1 %vm962_vm0, %v961_v8  ;;  %v528_v8 = vld [vmem:[%s1237_s3 + $0xd8] sm:$0xff] }
  0x1c   : > { %v905_v13 = vpack.c.bf16 %v528_v8, %v527_v7  ;;  %v516_v33 = vld [vmem:[%s1237_s3 + $0x78] sm:$0xff] }
  0x1d   : > { %922 = vmatpush3.bf16.msra.mxu1 %v921_v45  ;;  %892 = vmatpush3.bf16.msra.mxu0 %v891_v46  ;;  %v915_v34 = vpack.c.bf16 %v516_v33, %v515_v32 }
  0x1e   : > { %923 = vmatprep.subr.bf16.mxu1 %v960_v3  ;;  %894 = vmatprep.subr.bf16.mxu0 %v893_v49 }
  0x21   : > { %925 = vmatpush3.bf16.msra.mxu1 %v924_v54  ;;  %896 = vmatpush3.bf16.msra.mxu0 %v895_v55 }
  0x22   : > { %926 = vmatprep.subr.bf16.mxu1 %v960_v3  ;;  %898 = vmatprep.subr.bf16.mxu0 %v897_v58 }
  0x25   : > { %928 = vmatpush3.bf16.msra.mxu1 %v927_v63  ;;  %900 = vmatpush3.bf16.msra.mxu0 %v899_v0 }
  0x26   : > { %929 = vmatprep.subr.bf16.mxu1 %v960_v3  ;;  %902 = vmatprep.subr.bf16.mxu0 %v901_v4 }
  0x29   : > { %931 = vmatpush3.bf16.msra.mxu1 %v930_v9  ;;  %904 = vmatpush3.bf16.msra.mxu0 %v903_v10 }
  0x2a   : > { %932 = vmatprep.subr.bf16.mxu1 %v960_v3  ;;  %906 = vmatprep.subr.bf16.mxu0 %v905_v13 }
  0x2d   : > { %934 = vmatpush3.bf16.msra.mxu1 %v933_v14  ;;  %908 = vmatpush3.bf16.msra.mxu0 %v907_v17 }
  0x2e   : > { %935 = vmatprep.subr.bf16.mxu1 %v960_v3  ;;  %910 = vmatprep.subr.bf16.mxu0 %v909_v23 }
  0x31   : > { %937 = vmatpush3.bf16.msra.mxu1 %v936_v20  ;;  %912 = vmatpush3.bf16.msra.mxu0 %v911_v26 }
  0x32   : > { %938 = vmatprep.subr.bf16.mxu1 %v960_v3  ;;  %v913_v3 = vpack.c.bf16 %v532_v31, %v531_v30 }
  0x34   : > { %914 = vmatprep.subr.bf16.mxu0 %v913_v3 }
  0x35   : > { %940 = vmatpush3.bf16.msra.mxu1 %v939_v29  ;;  %916 = vmatpush3.bf16.msra.mxu0 %v915_v34 }
  0xe4   : > { %v273_v35 = vpop.f32.mrb[0].mxu0  ;;  %v344_v37 = vpop.f32.mrb[0].mxu1 }
  0xe5   : > { %v275_v36 = vpop.f32.mrb[1].mxu0  ;;  %v826_v38 = vpop.f32.mrb[1].mxu1 }
  0xea   : > { %v494_v39 = vpop.f32.mrb[2].mxu1  ;;  %v423_v40 = vpop.f32.mrb[2].mxu0 }
  0xeb   : > { %v500_v41 = vmul.f32 %v494_v39, %v344_v37  ;;  %v498_v42 = vmul.f32 %v423_v40, %v273_v35  ;;  %v425_v43 = vpop.f32.mrb[3].mxu0  ;;  %v835_v44 = vpop.f32.mrb[3].mxu1 }
  0xec   : > { %v499_v45 = vmul.f32 %v425_v43, %v275_v36 }
  0xed   : > { %869 = vmatmul.mubr.f32.vlgmr.msra.gmra.mrb[4].mxu1 %v500_v41 }
  0xee   : > { %613 = vmatprep.mubr.f32.mxu0 %v499_v45 }
  0xef   : > { %614 = vmatmul.mubr.f32.vlgmr.msra.gmra.mrb[4].mxu0 %v498_v42 }
 0x1c0   : > { %v685_v46 = vpop.f32.mrb[4].mxu1 }
 0x1c1   : > { %v870_v47 = vpop.f32.mrb[5].mxu1 }
 0x1c2   : > { %v798_v48 = vpop.f32.mrb[4].mxu0 }
 0x1c3   : > { %v799_v49 = vpop.f32.mrb[5].mxu0 }
 0x1c4   : > { %v800_v50 = vadd.f32 %v799_v49, %v798_v48 }
 0x1c6   : > { %v686_v51 = vadd.f32 %v800_v50, %v685_v46 }
 0x1c8   : > { %v689_v52 = vmul.f32 0.1, %v686_v51 }
 0x1ca   : > { %691 = vst.msk [vmem:[%s192_s13] sm:$0xff] %vm690_vm2, %v689_v52 }
 0x1cb PF: > { %s14_s15 = sadd.s32 1, %s958_s15  }
 0x1cc   : > { %p11_p4 = scmp.ge.s32.totalorder %s14_s15, 5  }
 0x1ce   :  { %13 = sbr.rel (!%p11_p4) target bundleno = 1 (0x1), region = 66 }

</bundles_post_ra>
